<compile_context>
chip_gen: v7x
topology: tpu7x:2x2x1
jax: 0.10.0
libtpu: 0.0.40
codegen_flags: <defaults>
</compile_context>

<pallas_src>
import functools

import jax
import jax.numpy as jnp
from jax.experimental import pallas as pl
from jax.experimental.pallas import tpu as pltpu


HEAD_HIDDEN = 64     # fixed by the module spec (Linear(128, 64) heads)
FEAT_DIM = 128       # fixed by the module spec (trunk output width)
NEG_BIG = -1e30      # additive mask value for non-action lanes (max branch)


def _round_up(x: int, m: int) -> int:
    return ((x + m - 1) // m) * m


def _num_tensorcores() -> int:
    """2 for v7x-class chips (2 TC/chip), else 1. Heuristic on device_kind."""
    try:
        kind = (getattr(jax.devices()[0], "device_kind", "") or "").lower()
        if "v7" in kind or "7x" in kind:
            return 2
    except Exception:
        pass
    return 1


def _choose_tile(B: int, batch_tile: int, num_cores: int) -> int:
    b16 = _round_up(B, 16)
    if num_cores >= 2 and b16 >= 32:
        # v7x: even number of grid steps so the two TensorCores stay balanced,
        # with tiles as large as batch_tile allows.
        n_pairs = pl.cdiv(b16, 2 * batch_tile)
        tile = _round_up(pl.cdiv(b16, 2 * n_pairs), 16)
    else:
        # Single TensorCore: one big tile (splitting only adds grid overhead).
        tile = min(batch_tile, b16)
    if tile >= B:
        # Single block covering the whole batch: use the exact batch size so the
        # block equals the full array dim (always a legal block shape).
        tile = B
    return tile


def _dueling_kernel(x_ref,
                    w1_ref, b1_ref,
                    w2_ref, b2_ref,
                    wh_ref, bh_ref,
                    wa2_ref, ba2_ref,
                    amask_ref,
                    out_ref,
                    *, use_max: bool, n_actions: int):
    # feature_embedding layer 1 in f32 (K = state_dim is tiny; keeps the kernel
    # closest to the PyTorch module's f32 semantics).
    x = x_ref[...]                                                   # (TB, S) f32
    h = jnp.dot(x, w1_ref[...], preferred_element_type=jnp.float32) + b1_ref[...]
    h = jnp.maximum(h, 0.0)

    # feature_embedding layer 2 (MXU feed dtype = packed weight dtype).
    h = jnp.dot(h.astype(w2_ref.dtype), w2_ref[...],
                preferred_element_type=jnp.float32) + b2_ref[...]
    h = jnp.maximum(h, 0.0)                                          # (TB, 128) f32

    # Fused head hidden layers: cols 0:64 = value hidden, cols 64:128 = advantage hidden.
    y = jnp.dot(h.astype(wh_ref.dtype), wh_ref[...],
                preferred_element_type=jnp.float32) + bh_ref[...]
    y = jnp.maximum(y, 0.0)                                          # (TB, 128) f32

    # Fused output matmul: cols 0:n_actions = advantage, col n_pad-1 = value
    # (wa2_blk has zeros everywhere else, so both heads read only their half of y).
    av = jnp.dot(y.astype(wa2_ref.dtype), wa2_ref[...],
                 preferred_element_type=jnp.float32) + ba2_ref[...]  # (TB, n_pad) f32
    n_pad = av.shape[1]
    V = av[:, n_pad - 1:]                                            # (TB, 1)

    if use_max:
        # amask = 0 for real action lanes, -1e30 for pad lanes and the V lane.
        center = jnp.max(av + amask_ref[...], axis=1, keepdims=True)
    else:
        # Pad lanes are exactly zero (zero weights + zero bias); only V must be
        # removed from the all-lane sum.
        center = (jnp.sum(av, axis=1, keepdims=True) - V) * (1.0 / n_actions)

    out_ref[...] = (av[:, :n_actions] + (V - center)).astype(out_ref.dtype)


def pack_params(p, n_actions: int, compute_dtype=jnp.bfloat16):
    """Fuse / pad the raw per-layer parameters for the kernel."""
    n_pad = max(128, _round_up(n_actions + 1, 128))   # +1 lane reserved for V
    v_col = n_pad - 1

    # Fused value/advantage hidden layer: (128, 128) weight, (1, 128) bias.
    w_heads = jnp.concatenate([p["wv1"], p["wa1"]], axis=1)
    b_heads = jnp.concatenate([p["bv1"], p["ba1"]], axis=1)

    # Fused output weight: advantage in cols 0:n_actions (rows 64:128),
    # value in the last column (rows 0:64); everything else zero.
    wa2_blk = jnp.zeros((FEAT_DIM, n_pad), jnp.float32)
    wa2_blk = wa2_blk.at[HEAD_HIDDEN:, :n_actions].set(p["wa2"])
    wa2_blk = wa2_blk.at[:HEAD_HIDDEN, v_col].set(p["wv2"][:, 0])

    ba2_pad = jnp.zeros((1, n_pad), jnp.float32)
    ba2_pad = ba2_pad.at[:, :n_actions].set(p["ba2"])
    ba2_pad = ba2_pad.at[:, v_col].set(p["bv2"][:, 0])

    # Additive lane mask for the max branch (precomputed; no iota in-kernel).
    amask = jnp.where(jnp.arange(n_pad) < n_actions, 0.0, NEG_BIG)
    amask = amask.astype(jnp.float32)[None, :]

    return dict(
        w1=p["w1"], b1=p["b1"],                       # layer 1 stays f32
        w2=p["w2"].astype(compute_dtype), b2=p["b2"],
        w_heads=w_heads.astype(compute_dtype), b_heads=b_heads,
        wa2_blk=wa2_blk.astype(compute_dtype), ba2=ba2_pad,
        amask=amask,
        n_actions=n_actions,
    )


def dueling_dqn_forward(x, packed, *, use_max: bool, batch_tile: int = 512,
                        out_dtype=jnp.float32):
    """x: (B, state_dim) float32. Returns (B, n_actions) in out_dtype."""
    B, state_dim = x.shape
    n_actions = packed["n_actions"]

    tile = _choose_tile(B, batch_tile, _num_tensorcores())
    grid = pl.cdiv(B, tile)   # ragged last block handled by Pallas masking

    kernel = functools.partial(_dueling_kernel, use_max=use_max,
                               n_actions=n_actions)

    # Constant index_map -> weight blocks never change across grid steps, so
    # they stay resident in VMEM (no per-step re-DMA).
    const = lambda a: pl.BlockSpec(a.shape, lambda i: (0, 0))

    out = pl.pallas_call(
        kernel,
        out_shape=jax.ShapeDtypeStruct((B, n_actions), out_dtype),
        grid_spec=pltpu.PrefetchScalarGridSpec(
            num_scalar_prefetch=0,
            grid=(grid,),
            in_specs=[
                pl.BlockSpec((tile, state_dim), lambda i: (i, 0)),   # x
                const(packed["w1"]), const(packed["b1"]),
                const(packed["w2"]), const(packed["b2"]),
                const(packed["w_heads"]), const(packed["b_heads"]),
                const(packed["wa2_blk"]), const(packed["ba2"]),
                const(packed["amask"]),
            ],
            out_specs=pl.BlockSpec((tile, n_actions), lambda i: (i, 0)),
        ),
        compiler_params=pltpu.CompilerParams(
            dimension_semantics=("parallel",)),
    )(x,
      packed["w1"], packed["b1"],
      packed["w2"], packed["b2"],
      packed["w_heads"], packed["b_heads"],
      packed["wa2_blk"], packed["ba2"],
      packed["amask"])

    return out


def init_params(key, state_dim: int, n_actions: int):
    """Deterministic init mimicking PyTorch nn.Linear default (U(-1/sqrt(fan_in), +))."""
    def linear(k, fan_in, fan_out):
        kw, kb = jax.random.split(k)
        bound = 1.0 / jnp.sqrt(fan_in)
        w = jax.random.uniform(kw, (fan_in, fan_out), jnp.float32, -bound, bound)
        b = jax.random.uniform(kb, (1, fan_out), jnp.float32, -bound, bound)
        return w, b

    ks = jax.random.split(key, 6)
    w1, b1 = linear(ks[0], state_dim, 256)
    w2, b2 = linear(ks[1], 256, FEAT_DIM)
    wv1, bv1 = linear(ks[2], FEAT_DIM, HEAD_HIDDEN)
    wv2, bv2 = linear(ks[3], HEAD_HIDDEN, 1)
    wa1, ba1 = linear(ks[4], FEAT_DIM, HEAD_HIDDEN)
    wa2, ba2 = linear(ks[5], HEAD_HIDDEN, n_actions)
    return dict(w1=w1, b1=b1, w2=w2, b2=b2,
                wv1=wv1, bv1=bv1, wv2=wv2, bv2=bv2,
                wa1=wa1, ba1=ba1, wa2=wa2, ba2=ba2)


def _reference_f32(x, p, use_max):
    """Pure-JAX f32 reference matching the original PyTorch module semantics."""
    h = jnp.maximum(x @ p["w1"] + p["b1"], 0.0)
    h = jnp.maximum(h @ p["w2"] + p["b2"], 0.0)
    hv = jnp.maximum(h @ p["wv1"] + p["bv1"], 0.0)
    ha = jnp.maximum(h @ p["wa1"] + p["ba1"], 0.0)
    V = hv @ p["wv2"] + p["bv2"]
    A = ha @ p["wa2"] + p["ba2"]
    c = jnp.max(A, axis=1, keepdims=True) if use_max else jnp.mean(A, axis=1, keepdims=True)
    return V + (A - c)


if __name__ == "__main__":
    batch = 2
    state_dim = 16
    n_actions = 8

    key = jax.random.PRNGKey(0)
    kx, kp = jax.random.split(key)
    x = jax.random.normal(kx, (batch, state_dim), jnp.float32)
    raw = init_params(kp, state_dim, n_actions)
    packed = pack_params(raw, n_actions)

    # use_max=True branch (tiny batch -> single full-array block).
    out = jax.block_until_ready(dueling_dqn_forward(x, packed, use_max=True))
    ref = _reference_f32(x, raw, use_max=True)
    assert out.shape == (batch, n_actions)
    assert jnp.allclose(out, ref, atol=5e-2, rtol=5e-2), "max-branch mismatch vs f32 reference"

    # use_max=False branch; small batch_tile forces a multi-step grid with a
    # ragged (masked) last block to exercise the no-host-pad path.
    x2 = jax.random.normal(jax.random.PRNGKey(1), (300, state_dim), jnp.float32)
    out2 = jax.block_until_ready(
        dueling_dqn_forward(x2, packed, use_max=False, batch_tile=128))
    ref2 = _reference_f32(x2, raw, use_max=False)
    assert out2.shape == (300, n_actions)
    assert jnp.allclose(out2, ref2, atol=5e-2, rtol=5e-2), "mean-branch mismatch vs f32 reference"

    print("KERNEL_OK")
</pallas_src>

<mosaic_0001>
module attributes {stable_mosaic.version = 11 : i64} {
  func.func @_dueling_kernel(%arg0: i32, %arg1: memref<2x16xf32, #tpu.memory_space<vmem>>, %arg2: memref<16x256xf32, #tpu.memory_space<vmem>>, %arg3: memref<1x256xf32, #tpu.memory_space<vmem>>, %arg4: memref<256x128xbf16, #tpu.memory_space<vmem>>, %arg5: memref<1x128xf32, #tpu.memory_space<vmem>>, %arg6: memref<128x128xbf16, #tpu.memory_space<vmem>>, %arg7: memref<1x128xf32, #tpu.memory_space<vmem>>, %arg8: memref<128x128xbf16, #tpu.memory_space<vmem>>, %arg9: memref<1x128xf32, #tpu.memory_space<vmem>>, %arg10: memref<1x128xf32, #tpu.memory_space<vmem>>, %arg11: memref<2x8xf32, #tpu.memory_space<vmem>>) attributes {dimension_semantics = [#tpu.dimension_semantics<parallel>], iteration_bounds = array<i64: 1>, scalar_prefetch = 0 : i64, scratch_operands = 0 : i64, tpu.core_type = #tpu.core_type<tc>, window_params = [{transform_indices = @transform_0, window_bounds = array<i64: 2, 16>}, {pipeline_mode = #tpu.pipeline_mode<synchronous>, transform_indices = @transform_1, window_bounds = array<i64: 16, 256>}, {pipeline_mode = #tpu.pipeline_mode<synchronous>, transform_indices = @transform_2, window_bounds = array<i64: 1, 256>}, {pipeline_mode = #tpu.pipeline_mode<synchronous>, transform_indices = @transform_3, window_bounds = array<i64: 256, 128>}, {pipeline_mode = #tpu.pipeline_mode<synchronous>, transform_indices = @transform_4, window_bounds = array<i64: 1, 128>}, {pipeline_mode = #tpu.pipeline_mode<synchronous>, transform_indices = @transform_5, window_bounds = array<i64: 128, 128>}, {pipeline_mode = #tpu.pipeline_mode<synchronous>, transform_indices = @transform_6, window_bounds = array<i64: 1, 128>}, {pipeline_mode = #tpu.pipeline_mode<synchronous>, transform_indices = @transform_7, window_bounds = array<i64: 128, 128>}, {pipeline_mode = #tpu.pipeline_mode<synchronous>, transform_indices = @transform_8, window_bounds = array<i64: 1, 128>}, {pipeline_mode = #tpu.pipeline_mode<synchronous>, transform_indices = @transform_9, window_bounds = array<i64: 1, 128>}, {transform_indices = @transform_10, window_bounds = array<i64: 2, 8>}]} {
    %c0 = arith.constant 0 : index
    %c0_0 = arith.constant 0 : index
    %0 = vector.load %arg1[%c0, %c0_0] : memref<2x16xf32, #tpu.memory_space<vmem>>, vector<2x16xf32>
    %c0_1 = arith.constant 0 : index
    %c0_2 = arith.constant 0 : index
    %1 = vector.load %arg2[%c0_1, %c0_2] : memref<16x256xf32, #tpu.memory_space<vmem>>, vector<16x256xf32>
    %cst = arith.constant dense<0.000000e+00> : vector<2x256xf32>
    %2 = tpu.matmul %0, %1, %cst {dimension_numbers = #tpu.dot_dimension_numbers<[1], [0], [0], [1], [0, 0, 1, 1], [], []>} : vector<2x16xf32>, vector<16x256xf32>, vector<2x256xf32> -> vector<2x256xf32>
    %c0_3 = arith.constant 0 : index
    %c0_4 = arith.constant 0 : index
    %3 = vector.load %arg3[%c0_3, %c0_4] : memref<1x256xf32, #tpu.memory_space<vmem>>, vector<1x256xf32>
    %4 = vector.broadcast %3 : vector<1x256xf32> to vector<2x256xf32>
    %5 = arith.addf %2, %4 : vector<2x256xf32>
    %cst_5 = arith.constant 0.000000e+00 : f32
    %6 = vector.broadcast %cst_5 : f32 to vector<2x256xf32>
    %7 = arith.maximumf %5, %6 : vector<2x256xf32>
    %8 = arith.truncf %7 : vector<2x256xf32> to vector<2x256xbf16>
    %c0_6 = arith.constant 0 : index
    %c0_7 = arith.constant 0 : index
    %9 = vector.load %arg4[%c0_6, %c0_7] : memref<256x128xbf16, #tpu.memory_space<vmem>>, vector<256x128xbf16>
    %cst_8 = arith.constant dense<0.000000e+00> : vector<2x128xf32>
    %10 = tpu.matmul %8, %9, %cst_8 {dimension_numbers = #tpu.dot_dimension_numbers<[1], [0], [0], [1], [0, 0, 1, 1], [], []>} : vector<2x256xbf16>, vector<256x128xbf16>, vector<2x128xf32> -> vector<2x128xf32>
    %c0_9 = arith.constant 0 : index
    %c0_10 = arith.constant 0 : index
    %11 = vector.load %arg5[%c0_9, %c0_10] : memref<1x128xf32, #tpu.memory_space<vmem>>, vector<1x128xf32>
    %12 = vector.broadcast %11 : vector<1x128xf32> to vector<2x128xf32>
    %13 = arith.addf %10, %12 : vector<2x128xf32>
    %cst_11 = arith.constant 0.000000e+00 : f32
    %14 = vector.broadcast %cst_11 : f32 to vector<2x128xf32>
    %15 = arith.maximumf %13, %14 : vector<2x128xf32>
    %16 = arith.truncf %15 : vector<2x128xf32> to vector<2x128xbf16>
    %c0_12 = arith.constant 0 : index
    %c0_13 = arith.constant 0 : index
    %17 = vector.load %arg6[%c0_12, %c0_13] : memref<128x128xbf16, #tpu.memory_space<vmem>>, vector<128x128xbf16>
    %cst_14 = arith.constant dense<0.000000e+00> : vector<2x128xf32>
    %18 = tpu.matmul %16, %17, %cst_14 {dimension_numbers = #tpu.dot_dimension_numbers<[1], [0], [0], [1], [0, 0, 1, 1], [], []>} : vector<2x128xbf16>, vector<128x128xbf16>, vector<2x128xf32> -> vector<2x128xf32>
    %c0_15 = arith.constant 0 : index
    %c0_16 = arith.constant 0 : index
    %19 = vector.load %arg7[%c0_15, %c0_16] : memref<1x128xf32, #tpu.memory_space<vmem>>, vector<1x128xf32>
    %20 = vector.broadcast %19 : vector<1x128xf32> to vector<2x128xf32>
    %21 = arith.addf %18, %20 : vector<2x128xf32>
    %cst_17 = arith.constant 0.000000e+00 : f32
    %22 = vector.broadcast %cst_17 : f32 to vector<2x128xf32>
    %23 = arith.maximumf %21, %22 : vector<2x128xf32>
    %24 = arith.truncf %23 : vector<2x128xf32> to vector<2x128xbf16>
    %c0_18 = arith.constant 0 : index
    %c0_19 = arith.constant 0 : index
    %25 = vector.load %arg8[%c0_18, %c0_19] : memref<128x128xbf16, #tpu.memory_space<vmem>>, vector<128x128xbf16>
    %cst_20 = arith.constant dense<0.000000e+00> : vector<2x128xf32>
    %26 = tpu.matmul %24, %25, %cst_20 {dimension_numbers = #tpu.dot_dimension_numbers<[1], [0], [0], [1], [0, 0, 1, 1], [], []>} : vector<2x128xbf16>, vector<128x128xbf16>, vector<2x128xf32> -> vector<2x128xf32>
    %c0_21 = arith.constant 0 : index
    %c0_22 = arith.constant 0 : index
    %27 = vector.load %arg9[%c0_21, %c0_22] : memref<1x128xf32, #tpu.memory_space<vmem>>, vector<1x128xf32>
    %28 = vector.broadcast %27 : vector<1x128xf32> to vector<2x128xf32>
    %29 = arith.addf %26, %28 : vector<2x128xf32>
    %30 = vector.extract_strided_slice %29 {offsets = [0, 127], sizes = [2, 1], strides = [1, 1]} : vector<2x128xf32> to vector<2x1xf32>
    %c0_23 = arith.constant 0 : index
    %c0_24 = arith.constant 0 : index
    %31 = vector.load %arg10[%c0_23, %c0_24] : memref<1x128xf32, #tpu.memory_space<vmem>>, vector<1x128xf32>
    %32 = vector.broadcast %31 : vector<1x128xf32> to vector<2x128xf32>
    %33 = arith.addf %29, %32 : vector<2x128xf32>
    %cst_25 = arith.constant dense<0xFF800000> : vector<2xf32>
    %34 = vector.multi_reduction <maximumf>, %33, %cst_25 [1] : vector<2x128xf32> to vector<2xf32>
    %35 = vector.shape_cast %34 : vector<2xf32> to vector<2x1xf32>
    %36 = vector.extract_strided_slice %29 {offsets = [0, 0], sizes = [2, 8], strides = [1, 1]} : vector<2x128xf32> to vector<2x8xf32>
    %37 = arith.subf %30, %35 : vector<2x1xf32>
    %38 = vector.broadcast %37 : vector<2x1xf32> to vector<2x8xf32>
    %39 = arith.addf %36, %38 : vector<2x8xf32>
    %c0_26 = arith.constant 0 : index
    %c0_27 = arith.constant 0 : index
    %40 = vector.load %arg11[%c0_26, %c0_27] : memref<2x8xf32, #tpu.memory_space<vmem>>, vector<2x8xf32>
    tpu.vector_store %arg11[%c0_26, %c0_27], %39 {strides = array<i32>} : memref<2x8xf32, #tpu.memory_space<vmem>>, vector<2x8xf32>,
    return
  }
  func.func @transform_0(%arg0: i32) -> (i32, i32) {
    %c0_i32 = arith.constant 0 : i32
    %c0_i32_0 = arith.constant 0 : i32
    return %arg0, %c0_i32 : i32, i32
  }
  func.func @transform_1(%arg0: i32) -> (i32, i32) {
    %c0_i32 = arith.constant 0 : i32
    %c0_i32_0 = arith.constant 0 : i32
    %c0_i32_1 = arith.constant 0 : i32
    return %c0_i32, %c0_i32_0 : i32, i32
  }
  func.func @transform_2(%arg0: i32) -> (i32, i32) {
    %c0_i32 = arith.constant 0 : i32
    %c0_i32_0 = arith.constant 0 : i32
    %c0_i32_1 = arith.constant 0 : i32
    return %c0_i32, %c0_i32_0 : i32, i32
  }
  func.func @transform_3(%arg0: i32) -> (i32, i32) {
    %c0_i32 = arith.constant 0 : i32
    %c0_i32_0 = arith.constant 0 : i32
    %c0_i32_1 = arith.constant 0 : i32
    return %c0_i32, %c0_i32_0 : i32, i32
  }
  func.func @transform_4(%arg0: i32) -> (i32, i32) {
    %c0_i32 = arith.constant 0 : i32
    %c0_i32_0 = arith.constant 0 : i32
    %c0_i32_1 = arith.constant 0 : i32
    return %c0_i32, %c0_i32_0 : i32, i32
  }
  func.func @transform_5(%arg0: i32) -> (i32, i32) {
    %c0_i32 = arith.constant 0 : i32
    %c0_i32_0 = arith.constant 0 : i32
    %c0_i32_1 = arith.constant 0 : i32
    return %c0_i32, %c0_i32_0 : i32, i32
  }
  func.func @transform_6(%arg0: i32) -> (i32, i32) {
    %c0_i32 = arith.constant 0 : i32
    %c0_i32_0 = arith.constant 0 : i32
    %c0_i32_1 = arith.constant 0 : i32
    return %c0_i32, %c0_i32_0 : i32, i32
  }
  func.func @transform_7(%arg0: i32) -> (i32, i32) {
    %c0_i32 = arith.constant 0 : i32
    %c0_i32_0 = arith.constant 0 : i32
    %c0_i32_1 = arith.constant 0 : i32
    return %c0_i32, %c0_i32_0 : i32, i32
  }
  func.func @transform_8(%arg0: i32) -> (i32, i32) {
    %c0_i32 = arith.constant 0 : i32
    %c0_i32_0 = arith.constant 0 : i32
    %c0_i32_1 = arith.constant 0 : i32
    return %c0_i32, %c0_i32_0 : i32, i32
  }
  func.func @transform_9(%arg0: i32) -> (i32, i32) {
    %c0_i32 = arith.constant 0 : i32
    %c0_i32_0 = arith.constant 0 : i32
    %c0_i32_1 = arith.constant 0 : i32
    return %c0_i32, %c0_i32_0 : i32, i32
  }
  func.func @transform_10(%arg0: i32) -> (i32, i32) {
    %c0_i32 = arith.constant 0 : i32
    %c0_i32_0 = arith.constant 0 : i32
    return %arg0, %c0_i32 : i32, i32
  }
}

</mosaic_0001>

<bundles_post_ra>
// kernel: tpu_custom_call.1
= control target key start
LH: loop header
LB: loop body
LE: loop exit
PB: predicated region body
PF: predicated region fallthrough
CT: control target
= control target key end

     0   :  { %15 = vsyncpa [#allocation3], 0  ;;  %s1128_s0 = inlined_call_operand.hbm [shape: f32[2,16], index: 0, kind: input, shape index: {}]   ;;  %s1129_s1 = inlined_call_operand.hbm [shape: f32[16,256], index: 1, kind: input, shape index: {}]   ;;  %s1130_s2 = inlined_call_operand.vmem [shape: f32[1,256], index: 2, kind: input, shape index: {}]   ;;  %s1131_s3 = inlined_call_operand.hbm [shape: bf16[256,128], index: 3, kind: input, shape index: {}]   ;;  %s1132_s4 = inlined_call_operand.vmem [shape: f32[1,128], index: 4, kind: input, shape index: {}]   ;;  %s1133_s5 = inlined_call_operand.hbm [shape: bf16[128,128], index: 5, kind: input, shape index: {}]   ;;  %s1134_s6 = inlined_call_operand.vmem [shape: f32[1,128], index: 6, kind: input, shape index: {}]   ;;  %s1135_s7 = inlined_call_operand.hbm [shape: bf16[128,128], index: 7, kind: input, shape index: {}]   ;;  %s1136_s8 = inlined_call_operand.vmem [shape: f32[1,128], index: 8, kind: input, shape index: {}]   ;;  %s1137_s9 = inlined_call_operand.vmem [shape: f32[1,128], index: 9, kind: input, shape index: {}]   ;;  %s1138_s10 = inlined_call_operand.hbm [shape: f32[2,8], index: 10, kind: output, shape index: {}]  }
   0x1   :  { %16 = vsyncpa [#allocation6], 0 }
   0x2   :  { %17 = vsyncpa [#allocation9], 0 }
   0x3   :  { %18 = vsyncpa [#allocation4], 0  ;;  %s945_s13 = smov [#allocation5]   ;;  %s805_s17 = scalar_lea.hbm %s1129_s1, 512 }
   0x4   :  { %s34_s14 = sshll.u32 %s945_s13, 4  ;;  %p806_p0 = scmp.ne.s32.totalorder %s1129_s1, %s805_s17  ;;  %s35_s14 = int_to_ptr.vmem [resolvable:$true] %s34_s14 }
   0x5   :  { %p809_p1 = scmp.lt.u32.totalorder %s805_s17, %s1129_s1 }
   0x7   :  { %p811_p2 = pnand %p809_p1, %p806_p0 }
   0x9   :  { %814 = shalt.err (!%p811_p2)
}
   0xa   :  { %s815_s22 = scalar_lea.vmem %s35_s14, 512  ;;  %p820_p4 = scmp.lt.s32.totalorder %s35_s14, %s35_s14 }
   0xb   :  { %p816_p3 = scmp.ne.s32.totalorder %s35_s14, %s815_s22  ;;  %p821_p5 = scmp.lt.s32.totalorder %s815_s22, %s815_s22 }
   0xd   :  { %p822_p6 = por %p821_p5, %p820_p4 }
   0xf   :  { %p823_p7 = pnand %p822_p6, %p816_p3 }
  0x11   :  { %826 = shalt.err (!%p823_p7)
}
  0x12   :  { %s946_s23 = smov 256   ;;  %s947_s24 = smov 16  }
  0x13   :  { %40 = dma.hbm_to_vmem [thread:$0]  %s1129_s1, 512, %s35_s14, [#allocation6], %s946_s23, %s946_s23, %s947_s24  }
  0x14   :  { %s948_s27 = smov [#allocation8]   ;;  %s949_s29 = smov [#allocation2]  }
  0x15   :  { %s62_s28 = sshll.u32 %s948_s27, 4  ;;  %s25_s30 = sshll.u32 %s949_s29, 4  ;;  %s63_s28 = int_to_ptr.vmem [resolvable:$true] %s62_s28  ;;  %s26_s30 = int_to_ptr.vmem [resolvable:$true] %s25_s30 }
  0x16   :  { %s827_s13 = scalar_lea.hbm %s1133_s5, 1024 }
  0x17   :  { %p828_p8 = scmp.ne.s32.totalorder %s1133_s5, %s827_s13  ;;  %p831_p9 = scmp.lt.u32.totalorder %s827_s13, %s1133_s5 }
  0x19   :  { %p833_p10 = pnand %p831_p9, %p828_p8 }
  0x1b   :  { %836 = shalt.err (!%p833_p10)
}
  0x1c   :  { %s837_s1 = scalar_lea.vmem %s63_s28, 1024  ;;  %p842_p12 = scmp.lt.s32.totalorder %s63_s28, %s63_s28 }
  0x1d   :  { %p838_p11 = scmp.ne.s32.totalorder %s63_s28, %s837_s1  ;;  %p843_p13 = scmp.lt.s32.totalorder %s837_s1, %s837_s1 }
  0x1f   :  { %p844_p0 = por %p843_p13, %p842_p12 }
  0x21   :  { %p845_p1 = pnand %p844_p0, %p838_p11 }
  0x23   :  { %848 = shalt.err (!%p845_p1)
}
  0x24   :  { %s950_s14 = smov 64   ;;  %s951_s19 = smov 4  }
  0x25   :  { %68 = dma.hbm_to_vmem [thread:$0]  %s1133_s5, 1024, %s63_s28, [#allocation9], %s950_s14, %s950_s14, %s951_s19  }
  0x26   :  { %s849_s24 = scalar_lea.hbm %s1128_s0, 32 }
  0x27   :  { %p850_p2 = scmp.ne.s32.totalorder %s1128_s0, %s849_s24  ;;  %p853_p3 = scmp.lt.u32.totalorder %s849_s24, %s1128_s0 }
  0x29   :  { %p855_p4 = pnand %p853_p3, %p850_p2 }
  0x2b   :  { %858 = shalt.err (!%p855_p4)
}
  0x2c   :  { %s859_s11 = scalar_lea.vmem %s26_s30, 32  ;;  %p864_p6 = scmp.lt.s32.totalorder %s26_s30, %s26_s30 }
  0x2d   :  { %p860_p5 = scmp.ne.s32.totalorder %s26_s30, %s859_s11  ;;  %p865_p7 = scmp.lt.s32.totalorder %s859_s11, %s859_s11 }
  0x2f   :  { %p866_p8 = por %p865_p7, %p864_p6 }
  0x31   :  { %p867_p9 = pnand %p866_p8, %p860_p5 }
  0x33   :  { %870 = shalt.err (!%p867_p9)
}
  0x34   :  { %28 = dma.hbm_to_vmem [thread:$0]  %s1128_s0, 32, %s26_s30, [#allocation3]  }
  0x35   :  { %s952_s12 = smov [#allocation7]   ;;  %s953_s15 = smov [#allocation10]  }
  0x36   :  { %s48_s13 = sshll.u32 %s952_s12, 4  ;;  %s76_s16 = sshll.u32 %s953_s15, 4  ;;  %s49_s13 = int_to_ptr.vmem [resolvable:$true] %s48_s13  ;;  %s77_s16 = int_to_ptr.vmem [resolvable:$true] %s76_s16 }
  0x37   :  { %s871_s1 = scalar_lea.hbm %s1131_s3, 2048 }
  0x38   :  { %p872_p10 = scmp.ne.s32.totalorder %s1131_s3, %s871_s1  ;;  %p875_p11 = scmp.lt.u32.totalorder %s871_s1, %s1131_s3 }
  0x3a   :  { %p877_p12 = pnand %p875_p11, %p872_p10 }
  0x3c   :  { %880 = shalt.err (!%p877_p12)
}
  0x3d   :  { %s881_s0 = scalar_lea.vmem %s49_s13, 2048  ;;  %p886_p0 = scmp.lt.s32.totalorder %s49_s13, %s49_s13 }
  0x3e   :  { %p882_p13 = scmp.ne.s32.totalorder %s49_s13, %s881_s0  ;;  %p887_p1 = scmp.lt.s32.totalorder %s881_s0, %s881_s0 }
  0x40   :  { %p888_p2 = por %p887_p1, %p886_p0 }
  0x42   :  { %p889_p3 = pnand %p888_p2, %p882_p13 }
  0x44   :  { %892 = shalt.err (!%p889_p3)
}
  0x45   :  { %54 = dma.hbm_to_vmem [thread:$0]  %s1131_s3, 2048, %s49_s13, [#allocation6], %s950_s14, %s950_s14, %s951_s19  }
  0x46   :  { %s893_s27 = scalar_lea.hbm %s1135_s7, 1024 }
  0x47   :  { %p894_p4 = scmp.ne.s32.totalorder %s1135_s7, %s893_s27  ;;  %p897_p5 = scmp.lt.u32.totalorder %s893_s27, %s1135_s7 }
  0x49   :  { %p899_p6 = pnand %p897_p5, %p894_p4 }
  0x4b   :  { %902 = shalt.err (!%p899_p6)
}
  0x4c   :  { %s903_s12 = scalar_lea.vmem %s77_s16, 1024  ;;  %p908_p8 = scmp.lt.s32.totalorder %s77_s16, %s77_s16 }
  0x4d   :  { %p904_p7 = scmp.ne.s32.totalorder %s77_s16, %s903_s12  ;;  %p909_p9 = scmp.lt.s32.totalorder %s903_s12, %s903_s12 }
  0x4f   :  { %p910_p10 = por %p909_p9, %p908_p8 }
  0x51   :  { %p911_p11 = pnand %p910_p10, %p904_p7 }
  0x53   :  { %914 = shalt.err (!%p911_p11)
}
  0x54   :  { %82 = dma.hbm_to_vmem [thread:$0]  %s1135_s7, 1024, %s77_s16, [#allocation9], %s950_s14, %s950_s14, %s951_s19  }
  0x55   :  { %937 = dma.done.wait [#allocation3], 32  }
  0x56   :  { %938 = vsyncadd [#allocation3], 4294967264 }
  0x57   :  { %939 = dma.done.wait [#allocation6], 2560  }
  0x58   :  { %940 = vsyncadd [#allocation6], 4294964736 }
  0x59   :  { %941 = dma.done.wait [#allocation9], 2048  }
  0x5a   :  { %942 = vsyncadd [#allocation9], 4294965248  ;;  %v954_v0 = vmov 0.0   ;;  %v105_v1 = vld [vmem:[#allocation5 + $0x8] sm:$0xff]  ;;  %v107_v2 = vld [vmem:[#allocation5 + $0x18] sm:$0xff]  ;;  %vm120_vm0 = vcmask 130048   ;;  %v110_v30 = vlaneseq }
  0x5b   :  { %188 = vmatprep.mubr.f32.mxu0 %v954_v0  ;;  %v104_v3 = vld [vmem:[#allocation5] sm:$0xff]  ;;  %v755_v4 = vpack.c.bf16 %v107_v2, %v105_v1  ;;  %v106_v5 = vld [vmem:[#allocation5 + $0x10] sm:$0xff]  ;;  %v103_v7 = vld [vmem:[#allocation2] sm:$0x3]  ;;  %vm955_vm1 = vmmov 0   ;;  %vm608_vm2 = vcmask 1041408  }
  0x5c   :  { %v757_v6 = vpack.c.bf16 %v106_v5, %v104_v3  ;;  %v773_v8 = vld [vmem:[#allocation7 + $0x40] sm:$0xff]   ;;  %v775_v10 = vld [vmem:[#allocation7 + $0x48] sm:$0xff]   ;;  %v777_v12 = vld [vmem:[#allocation7 + $0x50] sm:$0xff]   ;;  %v111_v31 = vshrl.u32 %v110_v30, 7  ;;  %vm619_vm3 = vcmask 58368  }
  0x5d   :  { %756 = vmatprep.subr.bf16.mxu0 %v755_v4  ;;  %v774_v9 = vld [vmem:[#allocation7] sm:$0xff]   ;;  %675 = vmatprep.subr.bf16.mxu1 %v773_v8  ;;  %v776_v11 = vld [vmem:[#allocation7 + $0x8] sm:$0xff]   ;;  %v778_v13 = vld [vmem:[#allocation7 + $0x10] sm:$0xff]  }
  0x5e   :  { %758 = vmatpush1.bf16.msra.mxu0 %v757_v6  ;;  %676 = vmatpush3.bf16.msra.mxu1 %v774_v9  ;;  %v779_v14 = vld [vmem:[#allocation7 + $0x58] sm:$0xff]   ;;  %v781_v16 = vld [vmem:[#allocation7 + $0x60] sm:$0xff]   ;;  %v783_v18 = vld [vmem:[#allocation7 + $0x68] sm:$0xff]   ;;  %v112_v32 = vsub.s32 0, %v111_v31  ;;  %v116_v34 = vsub.s32 1, %v111_v31 }
  0x5f   :  { %715 = vmatprep.subr.bf16.mxu0 %v954_v0  ;;  %677 = vmatprep.subr.bf16.mxu1 %v775_v10  ;;  %v780_v15 = vld [vmem:[#allocation7 + $0x18] sm:$0xff]   ;;  %v782_v17 = vld [vmem:[#allocation7 + $0x20] sm:$0xff]   ;;  %v784_v19 = vld [vmem:[#allocation7 + $0x28] sm:$0xff]  }
  0x60   :  { %v785_v20 = vld [vmem:[#allocation7 + $0x70] sm:$0xff]   ;;  %v787_v22 = vld [vmem:[#allocation7 + $0x78] sm:$0xff]   ;;  %v789_v24 = vld [vmem:[#allocation8] sm:$0xff]  }
  0x61   :  { %638 = vmatmul.mubr.msk.f32.vlgmr.msra.gmra.mrb[0].mxu0 %vm120_vm0, %v103_v7  ;;  %v786_v21 = vld [vmem:[#allocation7 + $0x30] sm:$0xff]   ;;  %v788_v23 = vld [vmem:[#allocation7 + $0x38] sm:$0xff]   ;;  %v790_v25 = vld [vmem:[#allocation8 + $0x8] sm:$0xff]  }
  0x62   :  { %678 = vmatpush3.bf16.msra.mxu1 %v776_v11  ;;  %716 = vmatpush3.bf16.msra.mxu0 %v789_v24  ;;  %v791_v26 = vld [vmem:[#allocation8 + $0x10] sm:$0xff]   ;;  %v792_v27 = vld [vmem:[#allocation8 + $0x18] sm:$0xff]   ;;  %v793_v28 = vld [vmem:[#allocation8 + $0x20] sm:$0xff]  }
  0x63   :  { %679 = vmatprep.subr.bf16.mxu1 %v777_v12  ;;  %717 = vmatprep.subr.bf16.mxu0 %v954_v0  ;;  %v794_v29 = vld [vmem:[#allocation8 + $0x28] sm:$0xff]   ;;  %v108_v33 = vld [vmem:[%s1130_s2] sm:$0x3]  ;;  %v795_v45 = vld [vmem:[#allocation8 + $0x30] sm:$0xff]  }
  0x64   :  { %v113_v35 = vrot.slane %v108_v33, %v112_v32  ;;  %v117_v36 = vrot.slane %v108_v33, %v116_v34  ;;  %v796_v46 = vld [vmem:[#allocation8 + $0x38] sm:$0xff]   ;;  %731 = vmatprep.mubr.msk.bf16.mxu0 %vm955_vm1, %v954_v0  ;;  %v797_v47 = vld [vmem:[#allocation10] sm:$0xff]   ;;  %v798_v48 = vld [vmem:[#allocation10 + $0x8] sm:$0xff]  }
  0x65   :  { %v799_v49 = vld [vmem:[#allocation10 + $0x10] sm:$0xff]   ;;  %v800_v50 = vld [vmem:[#allocation10 + $0x18] sm:$0xff]   ;;  %v801_v51 = vld [vmem:[#allocation10 + $0x20] sm:$0xff]  }
  0x66   :  { %680 = vmatpush3.bf16.msra.mxu1 %v778_v13  ;;  %718 = vmatpush3.bf16.msra.mxu0 %v790_v25  ;;  %v802_v52 = vld [vmem:[#allocation10 + $0x28] sm:$0xff]   ;;  %v639_v54 = vld [vmem:[%s1132_s4] ss:$0 sm:$0xff]  ;;  %v803_v62 = vld [vmem:[#allocation10 + $0x30] sm:$0xff]  }
  0x67   :  { %681 = vmatprep.subr.bf16.mxu1 %v779_v14  ;;  %719 = vmatprep.subr.bf16.mxu0 %v954_v0  ;;  %v804_v63 = vld [vmem:[#allocation10 + $0x38] sm:$0xff]  }
  0x68   :  { %v656_v1 = vld [vmem:[%s1134_s6] ss:$0 sm:$0xff]  ;;  %s957_s6 = smov [#allocation11]  }
  0x69   :  { %v665_v9 = vld [vmem:[%s1136_s8] ss:$0 sm:$0xff]  ;;  %s627_s8 = sshll.u32 %s957_s6, 4  ;;  %s628_s8 = int_to_ptr.vmem [resolvable:$true] %s627_s8 }
  0x6a   :  { %682 = vmatpush3.bf16.msra.mxu1 %v780_v15  ;;  %720 = vmatpush3.bf16.msra.mxu0 %v791_v26  ;;  %p920_p13 = scmp.lt.s32.totalorder %s628_s8, %s628_s8 }
  0x6b   :  { %683 = vmatprep.subr.bf16.mxu1 %v781_v16  ;;  %721 = vmatprep.subr.bf16.mxu0 %v954_v0 }
  0x6e   :  { %684 = vmatpush3.bf16.msra.mxu1 %v782_v17  ;;  %722 = vmatpush3.bf16.msra.mxu0 %v792_v27  ;;  %v956_v17 = vmov 127  }
  0x6f   :  { %685 = vmatprep.subr.bf16.mxu1 %v783_v18  ;;  %723 = vmatprep.subr.bf16.mxu0 %v954_v0 }
  0x70   :  { %772 = vset.pattern.permute.xlu0 %v956_v17 }
  0x72   :  { %686 = vmatpush3.bf16.msra.mxu1 %v784_v19  ;;  %724 = vmatpush3.bf16.msra.mxu0 %v793_v28 }
  0x73   :  { %687 = vmatprep.subr.bf16.mxu1 %v785_v20  ;;  %725 = vmatprep.subr.bf16.mxu0 %v954_v0 }
  0x76   :  { %688 = vmatpush3.bf16.msra.mxu1 %v786_v21  ;;  %726 = vmatpush3.bf16.msra.mxu0 %v794_v29 }
  0x77   :  { %689 = vmatprep.subr.bf16.mxu1 %v787_v22  ;;  %727 = vmatprep.subr.bf16.mxu0 %v954_v0 }
  0x7a   :  { %690 = vmatpush3.bf16.msra.mxu1 %v788_v23  ;;  %728 = vmatpush3.bf16.msra.mxu0 %v795_v45 }
  0x7b   :  { %735 = vmatprep.subr.bf16.mxu1 %v954_v0  ;;  %729 = vmatprep.subr.bf16.mxu0 %v954_v0 }
  0x7e   :  { %730 = vmatpush3.bf16.msra.mxu0 %v796_v46 }
 0x134   :  { %v190_v37 = vpop.f32.mrb[0].mxu0 }
 0x135   :  { %v191_v38 = vadd.f32 %v190_v37, %v113_v35  ;;  %v192_v39 = vpop.f32.mrb[1].mxu0 }
 0x136   :  { %v193_v40 = vadd.f32 %v192_v39, %v117_v36 }
 0x137   :  { %v195_v41 = vmax.f32 %v191_v38, 0.0 }
 0x138   :  { %v196_v42 = vmax.f32 %v193_v40, 0.0 }
 0x139   :  { %v197_v44 = vpack.c.bf16 %v195_v41, %v195_v41 }
 0x13a   :  { %v198_v43 = vpack.c.bf16 %v196_v42, %v196_v42 }
 0x13c   :  { %366 = vmatprep.mubr.bf16.mxu1 %v198_v43 }
 0x13d   :  { %367 = vmatmul.mubr.bf16.vlgmr.msra.gmra.mrb[0].mxu1 %v197_v44 }
 0x13e   :  { %751 = vmatprep.mubr.msk.bf16.mxu1 %vm955_vm1, %v954_v0  ;;  %736 = vmatpush3.bf16.msra.mxu1 %v797_v47 }
 0x13f   :  { %737 = vmatprep.subr.bf16.mxu1 %v954_v0 }
 0x142   :  { %738 = vmatpush3.bf16.msra.mxu1 %v798_v48 }
 0x143   :  { %739 = vmatprep.subr.bf16.mxu1 %v954_v0 }
 0x146   :  { %740 = vmatpush3.bf16.msra.mxu1 %v799_v49 }
 0x147   :  { %741 = vmatprep.subr.bf16.mxu1 %v954_v0 }
 0x14a   :  { %742 = vmatpush3.bf16.msra.mxu1 %v800_v50 }
 0x14b   :  { %743 = vmatprep.subr.bf16.mxu1 %v954_v0 }
 0x14e   :  { %744 = vmatpush3.bf16.msra.mxu1 %v801_v51 }
 0x14f   :  { %745 = vmatprep.subr.bf16.mxu1 %v954_v0 }
 0x152   :  { %746 = vmatpush3.bf16.msra.mxu1 %v802_v52 }
 0x153   :  { %747 = vmatprep.subr.bf16.mxu1 %v954_v0 }
 0x156   :  { %748 = vmatpush3.bf16.msra.mxu1 %v803_v62 }
 0x157   :  { %749 = vmatprep.subr.bf16.mxu1 %v954_v0  ;;  %v674_v0 = vld [vmem:[%s1137_s9] ss:$0 sm:$0xff]  ;;  %s915_s9 = scalar_lea.vmem %s628_s8, 32 }
 0x158   :  { %p916_p12 = scmp.ne.s32.totalorder %s628_s8, %s915_s9  ;;  %p921_p0 = scmp.lt.s32.totalorder %s915_s9, %s915_s9 }
 0x15a   :  { %750 = vmatpush3.bf16.msra.mxu1 %v804_v63  ;;  %p922_p1 = por %p921_p0, %p920_p13 }
 0x15c   :  { %p923_p2 = pnand %p922_p1, %p916_p12 }
 0x210   :  { %v691_v53 = vpop.f32.mrb[0].mxu1 }
 0x211   :  { %v692_v55 = vpop.f32.mrb[1].mxu1 }
 0x212   :  { %v693_v56 = vadd.f32 %v692_v55, %v691_v53  ;;  %v694_v57 = vpop.f32.mrb[2].mxu1 }
 0x213   :  { %v695_v58 = vpop.f32.mrb[3].mxu1 }
 0x214   :  { %v369_v59 = vadd.f32 %v693_v56, %v639_v54 }
 0x216   :  { %v374_v60 = vmax.f32 %v369_v59, 0.0 }
 0x218   :  { %v375_v61 = vpack.c.bf16 %v374_v60, %v374_v60 }
 0x21a   :  { %732 = vmatmul.mubr.bf16.vlgmr.msra.gmra.mrb[4].mxu0 %v375_v61 }
 0x2ed   :  { %v481_v2 = vpop.f32.mrb[4].mxu0 }
 0x2ee   :  { %v482_v3 = vadd.f32 %v656_v1, %v481_v2  ;;  %v733_v4 = vpop.f32.mrb[5].mxu0 }
 0x2ef   :  { %v484_v5 = vpop.f32.mrb[6].mxu0 }
 0x2f0   :  { %v487_v6 = vmax.f32 %v482_v3, 0.0  ;;  %v734_v7 = vpop.f32.mrb[7].mxu0 }
 0x2f2   :  { %v488_v8 = vpack.c.bf16 %v487_v6, %v487_v6 }
 0x2f4   :  { %752 = vmatmul.mubr.bf16.vlgmr.msra.gmra.mrb[4].mxu1 %v488_v8 }
 0x3c7   :  { %v594_v10 = vpop.f32.mrb[4].mxu1 }
 0x3c8   :  { %v595_v11 = vadd.f32 %v665_v9, %v594_v10  ;;  %v753_v12 = vpop.f32.mrb[5].mxu1 }
 0x3c9   :  { %v597_v13 = vpop.f32.mrb[6].mxu1 }
 0x3ca   :  { %v754_v14 = vpop.f32.mrb[7].mxu1  ;;  %v607_v15 = vadd.f32 %v674_v0, %v595_v11 }
 0x3cc   :  { %v609_v16 = vsel %vm608_vm2, %v607_v15, -inf }
 0x3cd   :  { %610 = vmax.xlane.f32.xlu0 %v609_v16 }
 0x45a   :  { %v611_v18 = vpop.xlane.xlu0 %610 }
 0x45b   :  { %v612_v19 = vsub.f32 %v595_v11, %v611_v18 }
 0x45d   :  { %615 = vperm.xlu0 %772, %v612_v19  }
 0x4dc   :  { %v616_v20 = vpop.permute.xlu0 %615 }
 0x4dd   :  { %v618_v21 = vadd.f32 %v616_v20, %v595_v11 }
 0x4df   :  { %620 = vst.msk [vmem:[#allocation11] sm:$0x3] %vm619_vm3, %v618_v21 }
 0x4e0   :  { %926 = shalt.err (!%p923_p2)
}
 0x4e1   :  { %s927_s22 = scalar_lea.hbm %s1138_s10, 32 }
 0x4e2   :  { %p928_p3 = scmp.ne.s32.totalorder %s1138_s10, %s927_s22  ;;  %p931_p4 = scmp.lt.u32.totalorder %s927_s22, %s1138_s10 }
 0x4e4   :  { %p933_p5 = pnand %p931_p4, %p928_p3 }
 0x4e6   :  { %936 = shalt.err (!%p933_p5)
}
 0x4e7   :  { %630 = dma.vmem_to_hbm [thread:$0]  %s628_s8, 32, %s1138_s10, [#allocation4]  }
 0x4e8   :  { %943 = dma.done.wait [#allocation4], 32  }
 0x4e9   :  { %944 = vsyncadd [#allocation4], 4294967264 }
 0x4ea   :  { %634 = vsyncpa [#allocation3], 1 }
 0x4eb   :  { %635 = vsyncpa [#allocation6], 1 }
 0x4ec   :  { %636 = vsyncpa [#allocation9], 1 }
 0x4ed   :  { %637 = vsyncpa [#allocation4], 1 }

</bundles_post_ra>
